<compile_context>
chip_gen: v7x
topology: tpu7x:2x2x1
jax: 0.10.0
libtpu: 0.0.40
codegen_flags: <defaults>
</compile_context>

<pallas_src>
import jax
import jax.numpy as jnp
from jax.experimental import pallas as pl
from jax.experimental.pallas import tpu as pltpu


def _round_up(x, m):
    return ((x + m - 1) // m) * m


def _chip_params():
    """(vmem_capacity_bytes, tensorcores_per_chip) with conservative fallbacks."""
    vmem_cap = 128 * 1024 * 1024       # v5e / v6e VMEM per TensorCore
    cores = 1                          # v5e / v6e have a single TensorCore
    try:
        kind = jax.devices()[0].device_kind.lower()
        if "v7" in kind:
            vmem_cap, cores = 64 * 1024 * 1024, 2
    except Exception:
        pass
    try:
        vmem_cap = int(pltpu.get_tpu_info().vmem_capacity_bytes)
    except Exception:
        pass
    return vmem_cap, cores


def _select_tile_m(N, E, H, B, vmem_cap, cores, hard_cap=2048):
    """Row tile: as big as fits on single-TC chips, >= 4 grid steps on v7x."""
    # Per-row VMEM of the streamed operands: x double buffer + A double buffer
    # (A's lane dim is padded to 128 in VMEM).
    per_row = (2 * E + 2 * max(B, 128)) * 4
    # Parameter blocks (worst case: double buffered) + slack.
    params_bytes = 2 * (E * H + H + H * B + B + 256) * 4
    budget = int(vmem_cap * 0.6) - params_bytes
    cap = max(8, min(hard_cap, (budget // per_row) // 8 * 8))

    n8 = _round_up(max(N, 1), 8)
    if cores >= 2 and N >= 4 * 256:
        # Two TensorCores share the "parallel" grid axis; >= 2 steps per core
        # keeps each core's x DMA double buffered instead of fully exposed.
        tile_m = min(cap, _round_up(pl.cdiv(N, 4), 256))
    else:
        # Single TC (v5e/v6e) or small bag: biggest tile that fits.
        tile_m = min(cap, n8)
    return max(8, tile_m)


def _make_att_kernel(branches):
    def kernel(x_ref, w1_ref, b1_ref, w2_ref, b2_ref, a_ref):
        # Layer 1 (E -> H) on the MXU with f32 accumulate, tanh on the EUP.
        h = jnp.tanh(
            jnp.dot(x_ref[...], w1_ref[...], preferred_element_type=jnp.float32)
            + b1_ref[...]
        )
        # Dropout(p=0.0) is the identity in the forward pass.
        if branches == 1:
            # w2_ref is (1, H): VPU broadcast-multiply + XLU cross-lane reduce.
            a = jnp.sum(h * w2_ref[...], axis=-1, keepdims=True) + b2_ref[...]
        else:
            # w2_ref is (H, B): one extra MXU matmul (MXU idle after layer 1).
            a = (
                jnp.dot(h, w2_ref[...], preferred_element_type=jnp.float32)
                + b2_ref[...]
            )
        a_ref[...] = a.astype(a_ref.dtype)

    return kernel


def att_net_forward(x, w1, b1, w2, b2, *, tile_m=None):
    """Pallas forward of Att_net: returns (A, x).

    x : (N, E) float32
    w1: (E, H)  b1: (H,)   -- Linear(embed -> hidden), weight pre-transposed
    w2: (H, B)  b2: (B,)   -- Linear(hidden -> branches), weight pre-transposed
    """
    N, E = x.shape
    H = w1.shape[1]
    B = w2.shape[1]

    vmem_cap, cores = _chip_params()
    if tile_m is None:
        tile_m = _select_tile_m(N, E, H, B, vmem_cap, cores)
    else:
        tile_m = max(8, _round_up(min(tile_m, _round_up(N, 8)), 8))

    # Ragged last block: Pallas masks the edge loads/stores, rows are
    # independent so garbage in the padded region never reaches the output.
    grid = (pl.cdiv(N, tile_m),)

    b1_2d = b1.reshape(1, H)
    b2_2d = b2.reshape(1, B)
    w2_in = w2.T if B == 1 else w2           # (1, H) VPU path / (H, B) MXU path

    cost = pl.CostEstimate(
        flops=2 * N * E * H + 2 * N * H * B,
        transcendentals=N * H,
        bytes_accessed=4 * (N * E + E * H + H + H * B + B + N * B),
    )

    # Explicit VMEM budget (x + A double buffers, params assumed double
    # buffered as the worst case), clamped to the chip's capacity.
    vmem_need = (
        2 * tile_m * E * 4
        + 2 * tile_m * max(B, 128) * 4
        + 2 * (E * H + H + H * B + B + 256) * 4
    )
    vmem_limit = int(min(vmem_cap, max(2 * vmem_need, 16 * 1024 * 1024)))

    def build_and_run(single_buffer_consts):
        def const_spec(shape):
            index_map = lambda i: (0,) * len(shape)
            if single_buffer_consts:
                # Constant-index blocks are never re-fetched; the default
                # second pipeline buffer is dead VMEM (matters on v7x 64 MiB).
                return pl.BlockSpec(shape, index_map,
                                    pipeline_mode=pl.Buffered(1))
            return pl.BlockSpec(shape, index_map)

        return pl.pallas_call(
            _make_att_kernel(B),
            out_shape=jax.ShapeDtypeStruct((N, B), x.dtype),
            grid_spec=pltpu.PrefetchScalarGridSpec(
                num_scalar_prefetch=0,
                grid=grid,
                in_specs=[
                    pl.BlockSpec((tile_m, E), lambda i: (i, 0)),  # x row tile
                    const_spec((E, H)),                            # W1
                    const_spec((1, H)),                            # b1
                    const_spec(w2_in.shape),                       # W2 / W2^T
                    const_spec((1, B)),                            # b2
                ],
                out_specs=pl.BlockSpec((tile_m, B), lambda i: (i, 0)),
            ),
            compiler_params=pltpu.CompilerParams(
                dimension_semantics=("parallel",),
                vmem_limit_bytes=vmem_limit,
            ),
            cost_estimate=cost,
        )(x, w1, b1_2d, w2_in, b2_2d)

    try:
        a = build_and_run(True)
    except Exception:
        # JAX version without per-BlockSpec pipeline_mode support (or stricter
        # lowering): fall back to default double buffering; correctness and
        # the rest of the optimizations are unaffected.
        a = build_and_run(False)

    return a, x


if __name__ == "__main__":
    key = jax.random.PRNGKey(0)

    def make_params(k, E, H, B):
        kw1, kb1, kw2, kb2 = jax.random.split(k, 4)
        w1 = (jax.random.uniform(kw1, (E, H), minval=-1.0, maxval=1.0)
              / jnp.sqrt(E)).astype(jnp.float32)
        b1 = (jax.random.uniform(kb1, (H,), minval=-1.0, maxval=1.0)
              / jnp.sqrt(E)).astype(jnp.float32)
        w2 = (jax.random.uniform(kw2, (H, B), minval=-1.0, maxval=1.0)
              / jnp.sqrt(H)).astype(jnp.float32)
        b2 = (jax.random.uniform(kb2, (B,), minval=-1.0, maxval=1.0)
              / jnp.sqrt(H)).astype(jnp.float32)
        return w1, b1, w2, b2

    def reference(x, w1, b1, w2, b2):
        return jnp.tanh(x @ w1 + b1) @ w2 + b2

    # Case 1: scaled-down module config, B=1 (VPU+XLU layer 2), N not a
    # multiple of 8 -> ragged block, no padded copy of x anywhere.
    N1, E1, H1, B1 = 13, 256, 64, 1
    kx1, kp1, key = jax.random.split(key, 3)
    x1 = jax.random.normal(kx1, (N1, E1), dtype=jnp.float32)
    p1 = make_params(kp1, E1, H1, B1)
    a1, xo1 = att_net_forward(x1, *p1)
    jax.block_until_ready((a1, xo1))
    assert a1.shape == (N1, B1) and xo1.shape == (N1, E1)
    assert jnp.allclose(a1, reference(x1, *p1), atol=3e-5, rtol=3e-5)
    assert jnp.array_equal(xo1, x1)

    # Case 2: multi-branch B=3 (MXU layer 2) with a forced small tile so the
    # grid has several steps and a ragged last block (37 = 16 + 16 + 5).
    N2, E2, H2, B2 = 37, 128, 32, 3
    kx2, kp2, key = jax.random.split(key, 3)
    x2 = jax.random.normal(kx2, (N2, E2), dtype=jnp.float32)
    p2 = make_params(kp2, E2, H2, B2)
    a2, xo2 = att_net_forward(x2, *p2, tile_m=16)
    jax.block_until_ready((a2, xo2))
    assert a2.shape == (N2, B2) and xo2.shape == (N2, E2)
    assert jnp.allclose(a2, reference(x2, *p2), atol=3e-5, rtol=3e-5)
    assert jnp.array_equal(xo2, x2)

    print("KERNEL_OK")
</pallas_src>

<mosaic_0001>
module attributes {stable_mosaic.version = 11 : i64} {
  func.func @kernel(%arg0: i32, %arg1: memref<16x256xf32, #tpu.memory_space<vmem>>, %arg2: memref<256x64xf32, #tpu.memory_space<vmem>>, %arg3: memref<1x64xf32, #tpu.memory_space<vmem>>, %arg4: memref<1x64xf32, #tpu.memory_space<vmem>>, %arg5: memref<1x1xf32, #tpu.memory_space<vmem>>, %arg6: memref<16x1xf32, #tpu.memory_space<vmem>>) attributes {dimension_semantics = [#tpu.dimension_semantics<parallel>], iteration_bounds = array<i64: 1>, scalar_prefetch = 0 : i64, scratch_operands = 0 : i64, tpu.core_type = #tpu.core_type<tc>, window_params = [{transform_indices = @transform_0, window_bounds = array<i64: 16, 256>}, {pipeline_mode = #tpu.pipeline_mode<synchronous>, transform_indices = @transform_1, window_bounds = array<i64: 256, 64>}, {pipeline_mode = #tpu.pipeline_mode<synchronous>, transform_indices = @transform_2, window_bounds = array<i64: 1, 64>}, {pipeline_mode = #tpu.pipeline_mode<synchronous>, transform_indices = @transform_3, window_bounds = array<i64: 1, 64>}, {pipeline_mode = #tpu.pipeline_mode<synchronous>, transform_indices = @transform_4, window_bounds = array<i64: 1, 1>}, {transform_indices = @transform_5, window_bounds = array<i64: 16, 1>}]} {
    %c0 = arith.constant 0 : index
    %c0_0 = arith.constant 0 : index
    %0 = vector.load %arg1[%c0, %c0_0] : memref<16x256xf32, #tpu.memory_space<vmem>>, vector<16x256xf32>
    %c0_1 = arith.constant 0 : index
    %c0_2 = arith.constant 0 : index
    %1 = vector.load %arg2[%c0_1, %c0_2] : memref<256x64xf32, #tpu.memory_space<vmem>>, vector<256x64xf32>
    %cst = arith.constant dense<0.000000e+00> : vector<16x64xf32>
    %2 = tpu.matmul %0, %1, %cst {dimension_numbers = #tpu.dot_dimension_numbers<[1], [0], [0], [1], [0, 0, 1, 1], [], []>} : vector<16x256xf32>, vector<256x64xf32>, vector<16x64xf32> -> vector<16x64xf32>
    %c0_3 = arith.constant 0 : index
    %c0_4 = arith.constant 0 : index
    %3 = vector.load %arg3[%c0_3, %c0_4] : memref<1x64xf32, #tpu.memory_space<vmem>>, vector<1x64xf32>
    %4 = vector.broadcast %3 : vector<1x64xf32> to vector<16x64xf32>
    %5 = arith.addf %2, %4 : vector<16x64xf32>
    %6 = math.tanh %5 : vector<16x64xf32>
    %c0_5 = arith.constant 0 : index
    %c0_6 = arith.constant 0 : index
    %7 = vector.load %arg4[%c0_5, %c0_6] : memref<1x64xf32, #tpu.memory_space<vmem>>, vector<1x64xf32>
    %8 = vector.broadcast %7 : vector<1x64xf32> to vector<16x64xf32>
    %9 = arith.mulf %6, %8 : vector<16x64xf32>
    %cst_7 = arith.constant dense<0.000000e+00> : vector<16xf32>
    %10 = vector.multi_reduction <add>, %9, %cst_7 [1] : vector<16x64xf32> to vector<16xf32>
    %11 = vector.shape_cast %10 : vector<16xf32> to vector<16x1xf32>
    %c0_8 = arith.constant 0 : index
    %c0_9 = arith.constant 0 : index
    %12 = vector.load %arg5[%c0_8, %c0_9] : memref<1x1xf32, #tpu.memory_space<vmem>>, vector<1x1xf32>
    %13 = vector.broadcast %12 : vector<1x1xf32> to vector<16x1xf32>
    %14 = arith.addf %11, %13 : vector<16x1xf32>
    %c0_10 = arith.constant 0 : index
    %c0_11 = arith.constant 0 : index
    %15 = vector.load %arg6[%c0_10, %c0_11] : memref<16x1xf32, #tpu.memory_space<vmem>>, vector<16x1xf32>
    tpu.vector_store %arg6[%c0_10, %c0_11], %14 {strides = array<i32>} : memref<16x1xf32, #tpu.memory_space<vmem>>, vector<16x1xf32>,
    return
  }
  func.func @transform_0(%arg0: i32) -> (i32, i32) {
    %c0_i32 = arith.constant 0 : i32
    %c0_i32_0 = arith.constant 0 : i32
    return %arg0, %c0_i32 : i32, i32
  }
  func.func @transform_1(%arg0: i32) -> (i32, i32) {
    %c0_i32 = arith.constant 0 : i32
    %c0_i32_0 = arith.constant 0 : i32
    %c0_i32_1 = arith.constant 0 : i32
    return %c0_i32, %c0_i32_0 : i32, i32
  }
  func.func @transform_2(%arg0: i32) -> (i32, i32) {
    %c0_i32 = arith.constant 0 : i32
    %c0_i32_0 = arith.constant 0 : i32
    %c0_i32_1 = arith.constant 0 : i32
    return %c0_i32, %c0_i32_0 : i32, i32
  }
  func.func @transform_3(%arg0: i32) -> (i32, i32) {
    %c0_i32 = arith.constant 0 : i32
    %c0_i32_0 = arith.constant 0 : i32
    %c0_i32_1 = arith.constant 0 : i32
    return %c0_i32, %c0_i32_0 : i32, i32
  }
  func.func @transform_4(%arg0: i32) -> (i32, i32) {
    %c0_i32 = arith.constant 0 : i32
    %c0_i32_0 = arith.constant 0 : i32
    %c0_i32_1 = arith.constant 0 : i32
    return %c0_i32, %c0_i32_0 : i32, i32
  }
  func.func @transform_5(%arg0: i32) -> (i32, i32) {
    %c0_i32 = arith.constant 0 : i32
    %c0_i32_0 = arith.constant 0 : i32
    return %arg0, %c0_i32 : i32, i32
  }
}

module attributes {stable_mosaic.version = 11 : i64} {
  func.func @kernel(%arg0: i32, %arg1: memref<16x256xf32, #tpu.memory_space<vmem>>, %arg2: memref<256x64xf32, #tpu.memory_space<vmem>>, %arg3: memref<1x64xf32, #tpu.memory_space<vmem>>, %arg4: memref<1x64xf32, #tpu.memory_space<vmem>>, %arg5: memref<1x1xf32, #tpu.memory_space<vmem>>, %arg6: memref<16x1xf32, #tpu.memory_space<vmem>>) attributes {dimension_semantics = [#tpu.dimension_semantics<parallel>], iteration_bounds = array<i64: 1>, scalar_prefetch = 0 : i64, scratch_operands = 0 : i64, tpu.core_type = #tpu.core_type<tc>, window_params = [{transform_indices = @transform_0, window_bounds = array<i64: 16, 256>}, {pipeline_mode = #tpu.pipeline_mode<synchronous>, transform_indices = @transform_1, window_bounds = array<i64: 256, 64>}, {pipeline_mode = #tpu.pipeline_mode<synchronous>, transform_indices = @transform_2, window_bounds = array<i64: 1, 64>}, {pipeline_mode = #tpu.pipeline_mode<synchronous>, transform_indices = @transform_3, window_bounds = array<i64: 1, 64>}, {pipeline_mode = #tpu.pipeline_mode<synchronous>, transform_indices = @transform_4, window_bounds = array<i64: 1, 1>}, {transform_indices = @transform_5, window_bounds = array<i64: 16, 1>}]} {
    %c0 = arith.constant 0 : index
    %c0_0 = arith.constant 0 : index
    %0 = vector.load %arg1[%c0, %c0_0] : memref<16x256xf32, #tpu.memory_space<vmem>>, vector<16x256xf32>
    %c0_1 = arith.constant 0 : index
    %c0_2 = arith.constant 0 : index
    %1 = vector.load %arg2[%c0_1, %c0_2] : memref<256x64xf32, #tpu.memory_space<vmem>>, vector<256x64xf32>
    %cst = arith.constant dense<0.000000e+00> : vector<16x64xf32>
    %2 = tpu.matmul %0, %1, %cst {dimension_numbers = #tpu.dot_dimension_numbers<[1], [0], [0], [1], [0, 0, 1, 1], [], []>} : vector<16x256xf32>, vector<256x64xf32>, vector<16x64xf32> -> vector<16x64xf32>
    %c0_3 = arith.constant 0 : index
    %c0_4 = arith.constant 0 : index
    %3 = vector.load %arg3[%c0_3, %c0_4] : memref<1x64xf32, #tpu.memory_space<vmem>>, vector<1x64xf32>
    %4 = vector.broadcast %3 : vector<1x64xf32> to vector<16x64xf32>
    %5 = arith.addf %2, %4 : vector<16x64xf32>
    %6 = math.tanh %5 : vector<16x64xf32>
    %c0_5 = arith.constant 0 : index
    %c0_6 = arith.constant 0 : index
    %7 = vector.load %arg4[%c0_5, %c0_6] : memref<1x64xf32, #tpu.memory_space<vmem>>, vector<1x64xf32>
    %8 = vector.broadcast %7 : vector<1x64xf32> to vector<16x64xf32>
    %9 = arith.mulf %6, %8 : vector<16x64xf32>
    %cst_7 = arith.constant dense<0.000000e+00> : vector<16xf32>
    %10 = vector.multi_reduction <add>, %9, %cst_7 [1] : vector<16x64xf32> to vector<16xf32>
    %11 = vector.shape_cast %10 : vector<16xf32> to vector<16x1xf32>
    %c0_8 = arith.constant 0 : index
    %c0_9 = arith.constant 0 : index
    %12 = vector.load %arg5[%c0_8, %c0_9] : memref<1x1xf32, #tpu.memory_space<vmem>>, vector<1x1xf32>
    %13 = vector.broadcast %12 : vector<1x1xf32> to vector<16x1xf32>
    %14 = arith.addf %11, %13 : vector<16x1xf32>
    %c0_10 = arith.constant 0 : index
    %c0_11 = arith.constant 0 : index
    %15 = vector.load %arg6[%c0_10, %c0_11] : memref<16x1xf32, #tpu.memory_space<vmem>>, vector<16x1xf32>
    tpu.vector_store %arg6[%c0_10, %c0_11], %14 {strides = array<i32>} : memref<16x1xf32, #tpu.memory_space<vmem>>, vector<16x1xf32>,
    return
  }
  func.func @transform_0(%arg0: i32) -> (i32, i32) {
    %c0_i32 = arith.constant 0 : i32
    %c0_i32_0 = arith.constant 0 : i32
    return %arg0, %c0_i32 : i32, i32
  }
  func.func @transform_1(%arg0: i32) -> (i32, i32) {
    %c0_i32 = arith.constant 0 : i32
    %c0_i32_0 = arith.constant 0 : i32
    %c0_i32_1 = arith.constant 0 : i32
    return %c0_i32, %c0_i32_0 : i32, i32
  }
  func.func @transform_2(%arg0: i32) -> (i32, i32) {
    %c0_i32 = arith.constant 0 : i32
    %c0_i32_0 = arith.constant 0 : i32
    %c0_i32_1 = arith.constant 0 : i32
    return %c0_i32, %c0_i32_0 : i32, i32
  }
  func.func @transform_3(%arg0: i32) -> (i32, i32) {
    %c0_i32 = arith.constant 0 : i32
    %c0_i32_0 = arith.constant 0 : i32
    %c0_i32_1 = arith.constant 0 : i32
    return %c0_i32, %c0_i32_0 : i32, i32
  }
  func.func @transform_4(%arg0: i32) -> (i32, i32) {
    %c0_i32 = arith.constant 0 : i32
    %c0_i32_0 = arith.constant 0 : i32
    %c0_i32_1 = arith.constant 0 : i32
    return %c0_i32, %c0_i32_0 : i32, i32
  }
  func.func @transform_5(%arg0: i32) -> (i32, i32) {
    %c0_i32 = arith.constant 0 : i32
    %c0_i32_0 = arith.constant 0 : i32
    return %arg0, %c0_i32 : i32, i32
  }
}

</mosaic_0001>

<bundles_post_ra>
// kernel: tpu_custom_call.1
= control target key start
LH: loop header
LB: loop body
LE: loop exit
PB: predicated region body
PF: predicated region fallthrough
CT: control target
= control target key end

     0   :  { %vm151_vm0 = vcmask 523264   ;;  %vm167_vm1 = vcmask 7168   ;;  %s420_s1 = inlined_call_operand.vmem [shape: f32[256,64], index: 1, kind: input, shape index: {}]   ;;  %s421_s0 = inlined_call_operand.vmem [shape: f32[13,256], index: 0, kind: input, shape index: {}]   ;;  %s422_s4 = inlined_call_operand.<no memory space> [shape: f32[1,1], index: 4, kind: input, shape index: {}]   ;;  %s423_s2 = inlined_call_operand.vmem [shape: f32[1,64], index: 2, kind: input, shape index: {}]   ;;  %s424_s3 = inlined_call_operand.vmem [shape: f32[1,64], index: 3, kind: input, shape index: {}]   ;;  %s425_s5 = inlined_call_operand.vmem [shape: f32[13,1], index: 5, kind: output, shape index: {}]  }
   0x1   :  { %v42_v0 = vld [vmem:[%s420_s1 + $0x80] sm:$0xff]  ;;  %v43_v1 = vld [vmem:[%s420_s1 + $0x88] sm:$0xff]  ;;  %v44_v5 = vld [vmem:[%s420_s1 + $0x90] sm:$0xff]  ;;  %v10_v52 = vstv %s422_s4 }
   0x2   :  { %v26_v2 = vld [vmem:[%s420_s1] sm:$0xff]  ;;  %v215_v3 = vpack.c.bf16 %v43_v1, %v42_v0  ;;  %v27_v4 = vld [vmem:[%s420_s1 + $0x8] sm:$0xff]  ;;  %v45_v6 = vld [vmem:[%s420_s1 + $0x98] sm:$0xff]  ;;  %11 = vst [vmem:[#allocation2] sm:$0x1] %v10_v52 }
   0x3   :  { %v217_v7 = vpack.c.bf16 %v27_v4, %v26_v2  ;;  %v219_v8 = vpack.c.bf16 %v45_v6, %v44_v5  ;;  %v28_v9 = vld [vmem:[%s420_s1 + $0x10] sm:$0xff]  ;;  %v29_v10 = vld [vmem:[%s420_s1 + $0x18] sm:$0xff]  ;;  %v46_v11 = vld [vmem:[%s420_s1 + $0xa0] sm:$0xff] }
   0x4   :  { %216 = vmatprep.subr.bf16.mxu0 %v215_v3  ;;  %247 = vmatprep.subr.bf16.mxu1 %v215_v3  ;;  %v47_v12 = vld [vmem:[%s420_s1 + $0xa8] sm:$0xff]  ;;  %v221_v13 = vpack.c.bf16 %v29_v10, %v28_v9  ;;  %v30_v15 = vld [vmem:[%s420_s1 + $0x20] sm:$0xff]  ;;  %v48_v17 = vld [vmem:[%s420_s1 + $0xb0] sm:$0xff] }
   0x5   :  { %218 = vmatpush3.bf16.msra.mxu0 %v217_v7  ;;  %255 = vmatpush3.bf16.msra.mxu1 %v217_v7  ;;  %v223_v14 = vpack.c.bf16 %v47_v12, %v46_v11  ;;  %v31_v16 = vld [vmem:[%s420_s1 + $0x28] sm:$0xff]  ;;  %v49_v18 = vld [vmem:[%s420_s1 + $0xb8] sm:$0xff]  ;;  %v32_v21 = vld [vmem:[%s420_s1 + $0x30] sm:$0xff] }
   0x6   :  { %220 = vmatprep.subr.bf16.mxu0 %v219_v8  ;;  %248 = vmatprep.subr.bf16.mxu1 %v219_v8  ;;  %v225_v19 = vpack.c.bf16 %v31_v16, %v30_v15  ;;  %v227_v20 = vpack.c.bf16 %v49_v18, %v48_v17  ;;  %v33_v22 = vld [vmem:[%s420_s1 + $0x38] sm:$0xff]  ;;  %v50_v23 = vld [vmem:[%s420_s1 + $0xc0] sm:$0xff]  ;;  %v51_v24 = vld [vmem:[%s420_s1 + $0xc8] sm:$0xff] }
   0x7   :  { %v23_v25 = vld [vmem:[%s421_s0 + $0x8] sm:$0xff]  ;;  %v25_v26 = vld [vmem:[%s421_s0 + $0x18] sm:$0xff]  ;;  %v229_v27 = vpack.c.bf16 %v33_v22, %v32_v21  ;;  %v231_v28 = vpack.c.bf16 %v51_v24, %v50_v23  ;;  %v34_v29 = vld [vmem:[%s420_s1 + $0x40] sm:$0xff] }
   0x8   :  { %129 = vmatprep.mubr.f32.mxu0 %v23_v25  ;;  %v35_v30 = vld [vmem:[%s420_s1 + $0x48] sm:$0xff]  ;;  %v52_v31 = vld [vmem:[%s420_s1 + $0xd0] sm:$0xff]  ;;  %v53_v32 = vld [vmem:[%s420_s1 + $0xd8] sm:$0xff]  ;;  %134 = vmatprep.mubr.f32.mxu1 %v25_v26 }
   0x9   :  { %222 = vmatpush3.bf16.msra.mxu0 %v221_v13  ;;  %256 = vmatpush3.bf16.msra.mxu1 %v221_v13  ;;  %v233_v33 = vpack.c.bf16 %v35_v30, %v34_v29  ;;  %v235_v34 = vpack.c.bf16 %v53_v32, %v52_v31  ;;  %v36_v35 = vld [vmem:[%s420_s1 + $0x50] sm:$0xff]  ;;  %v37_v36 = vld [vmem:[%s420_s1 + $0x58] sm:$0xff]  ;;  %v54_v37 = vld [vmem:[%s420_s1 + $0xe0] sm:$0xff] }
   0xa   :  { %224 = vmatprep.subr.bf16.mxu0 %v223_v14  ;;  %249 = vmatprep.subr.bf16.mxu1 %v223_v14  ;;  %v55_v38 = vld [vmem:[%s420_s1 + $0xe8] sm:$0xff]  ;;  %v237_v39 = vpack.c.bf16 %v37_v36, %v36_v35  ;;  %v38_v41 = vld [vmem:[%s420_s1 + $0x60] sm:$0xff]  ;;  %v56_v43 = vld [vmem:[%s420_s1 + $0xf0] sm:$0xff] }
   0xb   :  { %v239_v40 = vpack.c.bf16 %v55_v38, %v54_v37  ;;  %v39_v42 = vld [vmem:[%s420_s1 + $0x68] sm:$0xff]  ;;  %v57_v44 = vld [vmem:[%s420_s1 + $0xf8] sm:$0xff]  ;;  %v40_v47 = vld [vmem:[%s420_s1 + $0x70] sm:$0xff] }
   0xc   :  { %v241_v45 = vpack.c.bf16 %v39_v42, %v38_v41  ;;  %v243_v46 = vpack.c.bf16 %v57_v44, %v56_v43  ;;  %v41_v48 = vld [vmem:[%s420_s1 + $0x78] sm:$0xff]  ;;  %v22_v50 = vld [vmem:[%s421_s0] sm:$0xff]  ;;  %v24_v51 = vld [vmem:[%s421_s0 + $0x10] sm:$0xff] }
   0xd   :  { %226 = vmatpush3.bf16.msra.mxu0 %v225_v19  ;;  %257 = vmatpush3.bf16.msra.mxu1 %v225_v19  ;;  %v245_v49 = vpack.c.bf16 %v41_v48, %v40_v47  ;;  %v174_v55 = vld [vmem:[%s423_s2] ss:$0 sm:$0xff] }
   0xe   :  { %228 = vmatprep.subr.bf16.mxu0 %v227_v20  ;;  %250 = vmatprep.subr.bf16.mxu1 %v227_v20  ;;  %v175_v62 = vld [vmem:[%s424_s3] ss:$0 sm:$0xff] }
   0xf   :  { %v176_v5 = vld [vmem:[#allocation2] ss:$0 sm:$0xff] }
  0x11   :  { %230 = vmatpush3.bf16.msra.mxu0 %v229_v27  ;;  %258 = vmatpush3.bf16.msra.mxu1 %v229_v27 }
  0x12   :  { %232 = vmatprep.subr.bf16.mxu0 %v231_v28  ;;  %251 = vmatprep.subr.bf16.mxu1 %v231_v28 }
  0x15   :  { %234 = vmatpush3.bf16.msra.mxu0 %v233_v33  ;;  %259 = vmatpush3.bf16.msra.mxu1 %v233_v33 }
  0x16   :  { %236 = vmatprep.subr.bf16.mxu0 %v235_v34  ;;  %252 = vmatprep.subr.bf16.mxu1 %v235_v34 }
  0x19   :  { %238 = vmatpush3.bf16.msra.mxu0 %v237_v39  ;;  %260 = vmatpush3.bf16.msra.mxu1 %v237_v39 }
  0x1a   :  { %240 = vmatprep.subr.bf16.mxu0 %v239_v40  ;;  %253 = vmatprep.subr.bf16.mxu1 %v239_v40 }
  0x1d   :  { %242 = vmatpush3.bf16.msra.mxu0 %v241_v45  ;;  %261 = vmatpush3.bf16.msra.mxu1 %v241_v45 }
  0x1e   :  { %244 = vmatprep.subr.bf16.mxu0 %v243_v46  ;;  %254 = vmatprep.subr.bf16.mxu1 %v243_v46 }
  0x21   :  { %246 = vmatpush3.bf16.msra.mxu0 %v245_v49  ;;  %262 = vmatpush3.bf16.msra.mxu1 %v245_v49 }
  0x24   :  { %130 = vmatmul.mubr.f32.vlgmr.msra.gmra.mrb[0].mxu0 %v22_v50  ;;  %135 = vmatmul.mubr.f32.vlgmr.msra.gmra.mrb[0].mxu1 %v24_v51 }
  0xf7   :  { %v209_v53 = vpop.f32.mrb[0].mxu0  ;;  %v212_v54 = vpop.f32.mrb[0].mxu1 }
  0xf8   :  { %v210_v56 = vpop.f32.mrb[1].mxu0  ;;  %v213_v57 = vpop.f32.mrb[1].mxu1 }
  0xf9   :  { %v211_v58 = vadd.f32 %v210_v56, %v209_v53  ;;  %v214_v59 = vadd.f32 %v213_v57, %v212_v54 }
  0xfb   :  { %v132_v60 = vadd.f32 %v211_v58, %v174_v55  ;;  %v137_v61 = vadd.f32 %v214_v59, %v174_v55 }
  0xfd   :  { %263 = vtanh.f32 %v132_v60 }
  0xfe   :  { %265 = vtanh.f32 %v137_v61 }
 0x107   :  { %v264_v63 = vpop.eup %263 }
 0x108   :  { %v266_v0 = vpop.eup %265  ;;  %v149_v1 = vmul.f32 %v264_v63, %v175_v62 }
 0x109   :  { %v150_v2 = vmul.f32 %v266_v0, %v175_v62 }
 0x10a   :  { %v152_v3 = vsel %vm151_vm0, %v149_v1, 0.0 }
 0x10b   :  { %153 = vadd.xlane.f32.xlu0 %v152_v3  ;;  %v155_v4 = vsel %vm151_vm0, %v150_v2, 0.0 }
 0x10f   :  { %156 = vadd.xlane.f32.xlu0 %v155_v4 }
 0x198   :  { %v154_v6 = vpop.xlane.xlu0 %153 }
 0x199   :  { %v165_v7 = vadd.f32 %v176_v5, %v154_v6 }
 0x19b   :  { %168 = vst.msk [vmem:[%s425_s5] sm:$0xff] %vm167_vm1, %v165_v7 }
 0x19c   :  { %v157_v8 = vpop.xlane.xlu0 %156 }
 0x19d   :  { %v166_v9 = vadd.f32 %v176_v5, %v157_v8 }
 0x19f   :  { %169 = vst.msk [vmem:[%s425_s5 + $0x8] sm:$0xff] %vm167_vm1, %v166_v9 }

// kernel: tpu_custom_call.1
= control target key start
LH: loop header
LB: loop body
LE: loop exit
PB: predicated region body
PF: predicated region fallthrough
CT: control target
= control target key end

     0   :  { %vm151_vm0 = vcmask 523264   ;;  %vm167_vm1 = vcmask 7168   ;;  %s420_s1 = inlined_call_operand.vmem [shape: f32[256,64], index: 1, kind: input, shape index: {}]   ;;  %s421_s0 = inlined_call_operand.vmem [shape: f32[13,256], index: 0, kind: input, shape index: {}]   ;;  %s422_s4 = inlined_call_operand.<no memory space> [shape: f32[1,1], index: 4, kind: input, shape index: {}]   ;;  %s423_s2 = inlined_call_operand.vmem [shape: f32[1,64], index: 2, kind: input, shape index: {}]   ;;  %s424_s3 = inlined_call_operand.vmem [shape: f32[1,64], index: 3, kind: input, shape index: {}]   ;;  %s425_s5 = inlined_call_operand.vmem [shape: f32[13,1], index: 5, kind: output, shape index: {}]  }
   0x1   :  { %v42_v0 = vld [vmem:[%s420_s1 + $0x80] sm:$0xff]  ;;  %v43_v1 = vld [vmem:[%s420_s1 + $0x88] sm:$0xff]  ;;  %v44_v5 = vld [vmem:[%s420_s1 + $0x90] sm:$0xff]  ;;  %v10_v52 = vstv %s422_s4 }
   0x2   :  { %v26_v2 = vld [vmem:[%s420_s1] sm:$0xff]  ;;  %v215_v3 = vpack.c.bf16 %v43_v1, %v42_v0  ;;  %v27_v4 = vld [vmem:[%s420_s1 + $0x8] sm:$0xff]  ;;  %v45_v6 = vld [vmem:[%s420_s1 + $0x98] sm:$0xff]  ;;  %11 = vst [vmem:[#allocation2] sm:$0x1] %v10_v52 }
   0x3   :  { %v217_v7 = vpack.c.bf16 %v27_v4, %v26_v2  ;;  %v219_v8 = vpack.c.bf16 %v45_v6, %v44_v5  ;;  %v28_v9 = vld [vmem:[%s420_s1 + $0x10] sm:$0xff]  ;;  %v29_v10 = vld [vmem:[%s420_s1 + $0x18] sm:$0xff]  ;;  %v46_v11 = vld [vmem:[%s420_s1 + $0xa0] sm:$0xff] }
   0x4   :  { %216 = vmatprep.subr.bf16.mxu0 %v215_v3  ;;  %247 = vmatprep.subr.bf16.mxu1 %v215_v3  ;;  %v47_v12 = vld [vmem:[%s420_s1 + $0xa8] sm:$0xff]  ;;  %v221_v13 = vpack.c.bf16 %v29_v10, %v28_v9  ;;  %v30_v15 = vld [vmem:[%s420_s1 + $0x20] sm:$0xff]  ;;  %v48_v17 = vld [vmem:[%s420_s1 + $0xb0] sm:$0xff] }
   0x5   :  { %218 = vmatpush3.bf16.msra.mxu0 %v217_v7  ;;  %255 = vmatpush3.bf16.msra.mxu1 %v217_v7  ;;  %v223_v14 = vpack.c.bf16 %v47_v12, %v46_v11  ;;  %v31_v16 = vld [vmem:[%s420_s1 + $0x28] sm:$0xff]  ;;  %v49_v18 = vld [vmem:[%s420_s1 + $0xb8] sm:$0xff]  ;;  %v32_v21 = vld [vmem:[%s420_s1 + $0x30] sm:$0xff] }
   0x6   :  { %220 = vmatprep.subr.bf16.mxu0 %v219_v8  ;;  %248 = vmatprep.subr.bf16.mxu1 %v219_v8  ;;  %v225_v19 = vpack.c.bf16 %v31_v16, %v30_v15  ;;  %v227_v20 = vpack.c.bf16 %v49_v18, %v48_v17  ;;  %v33_v22 = vld [vmem:[%s420_s1 + $0x38] sm:$0xff]  ;;  %v50_v23 = vld [vmem:[%s420_s1 + $0xc0] sm:$0xff]  ;;  %v51_v24 = vld [vmem:[%s420_s1 + $0xc8] sm:$0xff] }
   0x7   :  { %v23_v25 = vld [vmem:[%s421_s0 + $0x8] sm:$0xff]  ;;  %v25_v26 = vld [vmem:[%s421_s0 + $0x18] sm:$0xff]  ;;  %v229_v27 = vpack.c.bf16 %v33_v22, %v32_v21  ;;  %v231_v28 = vpack.c.bf16 %v51_v24, %v50_v23  ;;  %v34_v29 = vld [vmem:[%s420_s1 + $0x40] sm:$0xff] }
   0x8   :  { %129 = vmatprep.mubr.f32.mxu0 %v23_v25  ;;  %v35_v30 = vld [vmem:[%s420_s1 + $0x48] sm:$0xff]  ;;  %v52_v31 = vld [vmem:[%s420_s1 + $0xd0] sm:$0xff]  ;;  %v53_v32 = vld [vmem:[%s420_s1 + $0xd8] sm:$0xff]  ;;  %134 = vmatprep.mubr.f32.mxu1 %v25_v26 }
   0x9   :  { %222 = vmatpush3.bf16.msra.mxu0 %v221_v13  ;;  %256 = vmatpush3.bf16.msra.mxu1 %v221_v13  ;;  %v233_v33 = vpack.c.bf16 %v35_v30, %v34_v29  ;;  %v235_v34 = vpack.c.bf16 %v53_v32, %v52_v31  ;;  %v36_v35 = vld [vmem:[%s420_s1 + $0x50] sm:$0xff]  ;;  %v37_v36 = vld [vmem:[%s420_s1 + $0x58] sm:$0xff]  ;;  %v54_v37 = vld [vmem:[%s420_s1 + $0xe0] sm:$0xff] }
   0xa   :  { %224 = vmatprep.subr.bf16.mxu0 %v223_v14  ;;  %249 = vmatprep.subr.bf16.mxu1 %v223_v14  ;;  %v55_v38 = vld [vmem:[%s420_s1 + $0xe8] sm:$0xff]  ;;  %v237_v39 = vpack.c.bf16 %v37_v36, %v36_v35  ;;  %v38_v41 = vld [vmem:[%s420_s1 + $0x60] sm:$0xff]  ;;  %v56_v43 = vld [vmem:[%s420_s1 + $0xf0] sm:$0xff] }
   0xb   :  { %v239_v40 = vpack.c.bf16 %v55_v38, %v54_v37  ;;  %v39_v42 = vld [vmem:[%s420_s1 + $0x68] sm:$0xff]  ;;  %v57_v44 = vld [vmem:[%s420_s1 + $0xf8] sm:$0xff]  ;;  %v40_v47 = vld [vmem:[%s420_s1 + $0x70] sm:$0xff] }
   0xc   :  { %v241_v45 = vpack.c.bf16 %v39_v42, %v38_v41  ;;  %v243_v46 = vpack.c.bf16 %v57_v44, %v56_v43  ;;  %v41_v48 = vld [vmem:[%s420_s1 + $0x78] sm:$0xff]  ;;  %v22_v50 = vld [vmem:[%s421_s0] sm:$0xff]  ;;  %v24_v51 = vld [vmem:[%s421_s0 + $0x10] sm:$0xff] }
   0xd   :  { %226 = vmatpush3.bf16.msra.mxu0 %v225_v19  ;;  %257 = vmatpush3.bf16.msra.mxu1 %v225_v19  ;;  %v245_v49 = vpack.c.bf16 %v41_v48, %v40_v47  ;;  %v174_v55 = vld [vmem:[%s423_s2] ss:$0 sm:$0xff] }
   0xe   :  { %228 = vmatprep.subr.bf16.mxu0 %v227_v20  ;;  %250 = vmatprep.subr.bf16.mxu1 %v227_v20  ;;  %v175_v62 = vld [vmem:[%s424_s3] ss:$0 sm:$0xff] }
   0xf   :  { %v176_v5 = vld [vmem:[#allocation2] ss:$0 sm:$0xff] }
  0x11   :  { %230 = vmatpush3.bf16.msra.mxu0 %v229_v27  ;;  %258 = vmatpush3.bf16.msra.mxu1 %v229_v27 }
  0x12   :  { %232 = vmatprep.subr.bf16.mxu0 %v231_v28  ;;  %251 = vmatprep.subr.bf16.mxu1 %v231_v28 }
  0x15   :  { %234 = vmatpush3.bf16.msra.mxu0 %v233_v33  ;;  %259 = vmatpush3.bf16.msra.mxu1 %v233_v33 }
  0x16   :  { %236 = vmatprep.subr.bf16.mxu0 %v235_v34  ;;  %252 = vmatprep.subr.bf16.mxu1 %v235_v34 }
  0x19   :  { %238 = vmatpush3.bf16.msra.mxu0 %v237_v39  ;;  %260 = vmatpush3.bf16.msra.mxu1 %v237_v39 }
  0x1a   :  { %240 = vmatprep.subr.bf16.mxu0 %v239_v40  ;;  %253 = vmatprep.subr.bf16.mxu1 %v239_v40 }
  0x1d   :  { %242 = vmatpush3.bf16.msra.mxu0 %v241_v45  ;;  %261 = vmatpush3.bf16.msra.mxu1 %v241_v45 }
  0x1e   :  { %244 = vmatprep.subr.bf16.mxu0 %v243_v46  ;;  %254 = vmatprep.subr.bf16.mxu1 %v243_v46 }
  0x21   :  { %246 = vmatpush3.bf16.msra.mxu0 %v245_v49  ;;  %262 = vmatpush3.bf16.msra.mxu1 %v245_v49 }
  0x24   :  { %130 = vmatmul.mubr.f32.vlgmr.msra.gmra.mrb[0].mxu0 %v22_v50  ;;  %135 = vmatmul.mubr.f32.vlgmr.msra.gmra.mrb[0].mxu1 %v24_v51 }
  0xf7   :  { %v209_v53 = vpop.f32.mrb[0].mxu0  ;;  %v212_v54 = vpop.f32.mrb[0].mxu1 }
  0xf8   :  { %v210_v56 = vpop.f32.mrb[1].mxu0  ;;  %v213_v57 = vpop.f32.mrb[1].mxu1 }
  0xf9   :  { %v211_v58 = vadd.f32 %v210_v56, %v209_v53  ;;  %v214_v59 = vadd.f32 %v213_v57, %v212_v54 }
  0xfb   :  { %v132_v60 = vadd.f32 %v211_v58, %v174_v55  ;;  %v137_v61 = vadd.f32 %v214_v59, %v174_v55 }
  0xfd   :  { %263 = vtanh.f32 %v132_v60 }
  0xfe   :  { %265 = vtanh.f32 %v137_v61 }
 0x107   :  { %v264_v63 = vpop.eup %263 }
 0x108   :  { %v266_v0 = vpop.eup %265  ;;  %v149_v1 = vmul.f32 %v264_v63, %v175_v62 }
 0x109   :  { %v150_v2 = vmul.f32 %v266_v0, %v175_v62 }
 0x10a   :  { %v152_v3 = vsel %vm151_vm0, %v149_v1, 0.0 }
 0x10b   :  { %153 = vadd.xlane.f32.xlu0 %v152_v3  ;;  %v155_v4 = vsel %vm151_vm0, %v150_v2, 0.0 }
 0x10f   :  { %156 = vadd.xlane.f32.xlu0 %v155_v4 }
 0x198   :  { %v154_v6 = vpop.xlane.xlu0 %153 }
 0x199   :  { %v165_v7 = vadd.f32 %v176_v5, %v154_v6 }
 0x19b   :  { %168 = vst.msk [vmem:[%s425_s5] sm:$0xff] %vm167_vm1, %v165_v7 }
 0x19c   :  { %v157_v8 = vpop.xlane.xlu0 %156 }
 0x19d   :  { %v166_v9 = vadd.f32 %v176_v5, %v157_v8 }
 0x19f   :  { %169 = vst.msk [vmem:[%s425_s5 + $0x8] sm:$0xff] %vm167_vm1, %v166_v9 }

</bundles_post_ra>
